<compile_context>
chip_gen: v7x
topology: tpu7x:2x2x1
jax: 0.10.0
libtpu: 0.0.40
codegen_flags: <defaults>
</compile_context>

<pallas_src>
import jax
import jax.numpy as jnp
from jax.experimental import pallas as pl
from jax.experimental.pallas import tpu as pltpu


# ---------------------------------------------------------------------------
# Kernels
# ---------------------------------------------------------------------------
def _linear_kernel(x_ref, w_ref, b_ref, o_ref):
    """No K-tiling: one dot per (batch, out-tile, L-tile) grid point.

    x_ref: (1, K, TL)   w_ref: (TO, K)   b_ref: (TO, 1) f32   o_ref: (1, TO, TL)
    """
    y = jnp.dot(w_ref[...], x_ref[0], preferred_element_type=jnp.float32)
    o_ref[0] = (y + b_ref[...]).astype(o_ref.dtype)


def _linear_kernel_ktiled(x_ref, w_ref, b_ref, o_ref, acc_ref):
    """K-tiled variant: trailing 'arbitrary' axis reduces over in_features.

    acc_ref: (TO, TL) f32 VMEM accumulator, resident across the K axis.
    """
    k = pl.program_id(3)

    @pl.when(k == 0)
    def _():
        acc_ref[...] = jnp.zeros_like(acc_ref)

    acc_ref[...] += jnp.dot(w_ref[...], x_ref[0],
                            preferred_element_type=jnp.float32)

    @pl.when(k == pl.num_programs(3) - 1)
    def _():
        o_ref[0] = (acc_ref[...] + b_ref[...]).astype(o_ref.dtype)


# ---------------------------------------------------------------------------
# Planning helpers
# ---------------------------------------------------------------------------
def _vmem_capacity_bytes():
    try:
        return int(pltpu.get_tpu_info().vmem_capacity_bytes)
    except Exception:
        return 64 * 1024 * 1024   # conservative (v7x-sized) fallback


def _largest_divisor_tile(dim, candidates):
    for c in candidates:
        if dim % c == 0:
            return c
    return None


def _footprint_bytes(TL, TO, TK, out_features, in_features, cbytes, obytes):
    resident_w = (TO == out_features) and (TK == in_features)
    ktiled = TK < in_features
    x_buf = 2 * TK * TL * cbytes                    # double-buffered input tile
    o_buf = 2 * TO * TL * obytes                    # double-buffered output tile
    w_buf = (1 if resident_w else 2) * TO * TK * cbytes
    b_buf = 2 * TO * 4
    acc = TO * TL * 4 if ktiled else 0
    return x_buf + o_buf + w_buf + b_buf + acc


def _plan_tiles(in_features, out_features, L, cbytes, obytes, vmem_budget):
    """Pick (TL, TO, TK) so the pipelined working set fits the VMEM budget."""
    O, K = out_features, in_features
    TO, TK = O, K

    # Tile out_features when a fully resident W would eat too much VMEM.
    if O * K * cbytes > vmem_budget // 3:
        t = _largest_divisor_tile(O, (512, 256, 128))
        if t is not None:
            TO = t

    # Tile the contraction dim too if the per-out-tile W slab is still large.
    # (K tiles must divide in_features exactly: overhang in the contraction
    #  dim would corrupt the reduction, unlike overhang on the L/out dims.)
    if TO * K * cbytes > vmem_budget // 3:
        t = _largest_divisor_tile(K, (2048, 1024, 512, 256))
        if t is not None:
            TK = t

    # L tile: biggest lane-dense (multiple-of-128) tile that fits the budget.
    if L < 128:
        TL = L                                       # full-extent block (legal)
    else:
        TL = 128
        for cand in (1024, 512, 256):
            if cand <= L and _footprint_bytes(
                    cand, TO, TK, O, K, cbytes, obytes) <= vmem_budget:
                TL = cand
                break
    return TL, TO, TK


def _block_spec(shape, index_map, buffer_count=None):
    """BlockSpec helper; falls back gracefully if pipeline_mode is unsupported."""
    if buffer_count is not None:
        try:
            return pl.BlockSpec(shape, index_map,
                                pipeline_mode=pl.Buffered(buffer_count))
        except TypeError:
            pass
    return pl.BlockSpec(shape, index_map)


# ---------------------------------------------------------------------------
# Wrapper
# ---------------------------------------------------------------------------
def linear_model_forward(x, weight, bias, *, compute_dtype=None,
                         _plan_override=None):
    """x: (B, in_features, L); weight: (out, in); bias: (out,).

    Returns (B, out_features, L), matching the PyTorch module's forward.
    compute_dtype: optional (e.g. jnp.bfloat16) MXU compute dtype; accumulation
    stays in f32 and the output keeps the input dtype.
    """
    B, in_features, L = x.shape
    out_features = weight.shape[0]
    out_dtype = x.dtype

    if compute_dtype is not None and x.dtype != jnp.dtype(compute_dtype):
        x = x.astype(compute_dtype)
        weight = weight.astype(compute_dtype)
    cbytes = jnp.dtype(x.dtype).itemsize
    obytes = jnp.dtype(out_dtype).itemsize

    vmem_cap = _vmem_capacity_bytes()
    vmem_budget = int(vmem_cap * 0.7)

    if _plan_override is not None:
        TL, TO, TK = _plan_override
    else:
        TL, TO, TK = _plan_tiles(in_features, out_features, L,
                                 cbytes, obytes, vmem_budget)

    n_l = pl.cdiv(L, TL)           # ragged tail block is masked by Pallas
    n_o = out_features // TO
    n_k = in_features // TK
    footprint = _footprint_bytes(TL, TO, TK, out_features, in_features,
                                 cbytes, obytes)
    vmem_limit = min(int(vmem_cap * 0.9),
                     max(32 * 1024 * 1024, 2 * footprint))

    # Bias as an f32 column so the broadcast-add happens in f32.
    bias_col = bias.astype(jnp.float32).reshape(out_features, 1)

    if n_k == 1:
        kernel = _linear_kernel
        grid = (B, n_o, n_l)
        resident = (n_o == 1)       # constant index map -> single-buffer it
        in_specs = [
            pl.BlockSpec((1, in_features, TL), lambda b, o, l: (b, 0, l)),
            _block_spec((TO, in_features), lambda b, o, l: (o, 0),
                        buffer_count=1 if resident else None),
            _block_spec((TO, 1), lambda b, o, l: (o, 0),
                        buffer_count=1 if resident else None),
        ]
        out_spec = pl.BlockSpec((1, TO, TL), lambda b, o, l: (b, o, l))
        scratch = []
        dims = ("parallel", "parallel", "parallel")
    else:
        kernel = _linear_kernel_ktiled
        grid = (B, n_o, n_l, n_k)   # reduction axis last
        in_specs = [
            pl.BlockSpec((1, TK, TL), lambda b, o, l, k: (b, k, l)),
            pl.BlockSpec((TO, TK), lambda b, o, l, k: (o, k)),
            pl.BlockSpec((TO, 1), lambda b, o, l, k: (o, 0)),
        ]
        out_spec = pl.BlockSpec((1, TO, TL), lambda b, o, l, k: (b, o, l))
        scratch = [pltpu.VMEM((TO, TL), jnp.float32)]
        dims = ("parallel", "parallel", "parallel", "arbitrary")

    cost = pl.CostEstimate(
        flops=2 * B * L * in_features * out_features,
        transcendentals=0,
        bytes_accessed=(B * in_features * L * cbytes
                        + out_features * in_features * cbytes
                        + out_features * 4
                        + B * out_features * L * obytes))

    y = pl.pallas_call(
        kernel,
        out_shape=jax.ShapeDtypeStruct((B, out_features, L), out_dtype),
        grid_spec=pltpu.PrefetchScalarGridSpec(
            num_scalar_prefetch=0,
            grid=grid,
            in_specs=in_specs,
            out_specs=out_spec,
            scratch_shapes=scratch),
        compiler_params=pltpu.CompilerParams(
            dimension_semantics=dims,
            vmem_limit_bytes=int(vmem_limit)),
        cost_estimate=cost,
    )(x, weight, bias_col)

    return y


if __name__ == "__main__":
    k1, k2, k3, k4, k5, k6 = jax.random.split(jax.random.PRNGKey(0), 6)

    # ---- Case 1: module-like toy shapes (resident-weight kernel) -----------
    in1, out1, B1, L1 = 32, 16, 2, 8
    bound1 = 1.0 / jnp.sqrt(jnp.float32(in1))
    w1 = jax.random.uniform(k1, (out1, in1), jnp.float32, -bound1, bound1)
    b1 = jax.random.uniform(k2, (out1,), jnp.float32, -bound1, bound1)
    x1 = jax.random.normal(k3, (B1, in1, L1), jnp.float32)
    ref1 = jnp.einsum("bil,oi->bol", x1, w1) + b1[None, :, None]

    y1 = jax.block_until_ready(linear_model_forward(x1, w1, b1))
    assert y1.shape == (B1, out1, L1)
    assert jnp.allclose(y1, ref1, atol=1e-5, rtol=1e-5)

    # bf16 MXU path (f32 accumulation retained; looser tolerance).
    y1_bf16 = jax.block_until_ready(
        linear_model_forward(x1, w1, b1, compute_dtype=jnp.bfloat16))
    assert y1_bf16.shape == (B1, out1, L1)
    assert jnp.allclose(y1_bf16, ref1, atol=5e-2, rtol=5e-2)

    # ---- Case 2: tile-aligned shapes exercising the K-tiled accumulator ----
    in2, out2, B2, L2 = 256, 16, 2, 128
    bound2 = 1.0 / jnp.sqrt(jnp.float32(in2))
    w2 = jax.random.uniform(k4, (out2, in2), jnp.float32, -bound2, bound2)
    b2 = jax.random.uniform(k5, (out2,), jnp.float32, -bound2, bound2)
    x2 = jax.random.normal(k6, (B2, in2, L2), jnp.float32)
    ref2 = jnp.einsum("bil,oi->bol", x2, w2) + b2[None, :, None]

    y2 = jax.block_until_ready(
        linear_model_forward(x2, w2, b2, _plan_override=(128, out2, 128)))
    assert y2.shape == (B2, out2, L2)
    assert jnp.allclose(y2, ref2, atol=1e-4, rtol=1e-4)

    print("KERNEL_OK")
</pallas_src>

<mosaic_0001>
module attributes {stable_mosaic.version = 11 : i64} {
  func.func @_linear_kernel(%arg0: i32, %arg1: i32, %arg2: i32, %arg3: memref<1x32x8xf32, #tpu.memory_space<vmem>>, %arg4: memref<16x32xf32, #tpu.memory_space<vmem>>, %arg5: memref<16x1xf32, #tpu.memory_space<vmem>>, %arg6: memref<1x16x8xf32, #tpu.memory_space<vmem>>) attributes {dimension_semantics = [#tpu.dimension_semantics<parallel>, #tpu.dimension_semantics<parallel>, #tpu.dimension_semantics<parallel>], iteration_bounds = array<i64: 2, 1, 1>, scalar_prefetch = 0 : i64, scratch_operands = 0 : i64, tpu.core_type = #tpu.core_type<tc>, window_params = [{transform_indices = @transform_0, window_bounds = array<i64: 1, 32, 8>}, {pipeline_mode = #tpu.pipeline_mode<synchronous>, transform_indices = @transform_1, window_bounds = array<i64: 16, 32>}, {pipeline_mode = #tpu.pipeline_mode<synchronous>, transform_indices = @transform_2, window_bounds = array<i64: 16, 1>}, {transform_indices = @transform_3, window_bounds = array<i64: 1, 16, 8>}]} {
    %c0 = arith.constant 0 : index
    %c0_0 = arith.constant 0 : index
    %0 = vector.load %arg4[%c0, %c0_0] : memref<16x32xf32, #tpu.memory_space<vmem>>, vector<16x32xf32>
    %c0_1 = arith.constant 0 : index
    %c0_2 = arith.constant 0 : index
    %c0_3 = arith.constant 0 : index
    %1 = vector.load %arg3[%c0_1, %c0_2, %c0_3] : memref<1x32x8xf32, #tpu.memory_space<vmem>>, vector<1x32x8xf32>
    %2 = vector.shape_cast %1 : vector<1x32x8xf32> to vector<32x8xf32>
    %cst = arith.constant dense<0.000000e+00> : vector<16x8xf32>
    %3 = tpu.matmul %0, %2, %cst {dimension_numbers = #tpu.dot_dimension_numbers<[1], [0], [0], [1], [0, 0, 1, 1], [], []>} : vector<16x32xf32>, vector<32x8xf32>, vector<16x8xf32> -> vector<16x8xf32>
    %c0_4 = arith.constant 0 : index
    %c0_5 = arith.constant 0 : index
    %4 = vector.load %arg5[%c0_4, %c0_5] : memref<16x1xf32, #tpu.memory_space<vmem>>, vector<16x1xf32>
    %5 = vector.broadcast %4 : vector<16x1xf32> to vector<16x8xf32>
    %6 = arith.addf %3, %5 : vector<16x8xf32>
    %c0_6 = arith.constant 0 : index
    %c0_7 = arith.constant 0 : index
    %c0_8 = arith.constant 0 : index
    %7 = vector.load %arg6[%c0_6, %c0_7, %c0_8] : memref<1x16x8xf32, #tpu.memory_space<vmem>>, vector<1x16x8xf32>
    %8 = vector.shape_cast %7 : vector<1x16x8xf32> to vector<16x8xf32>
    %9 = vector.shape_cast %6 : vector<16x8xf32> to vector<1x16x8xf32>
    tpu.vector_store %arg6[%c0_6, %c0_7, %c0_8], %9 {strides = array<i32>} : memref<1x16x8xf32, #tpu.memory_space<vmem>>, vector<1x16x8xf32>,
    return
  }
  func.func @transform_0(%arg0: i32, %arg1: i32, %arg2: i32) -> (i32, i32, i32) {
    %c0_i32 = arith.constant 0 : i32
    %c0_i32_0 = arith.constant 0 : i32
    return %arg0, %c0_i32, %arg2 : i32, i32, i32
  }
  func.func @transform_1(%arg0: i32, %arg1: i32, %arg2: i32) -> (i32, i32) {
    %c0_i32 = arith.constant 0 : i32
    %c0_i32_0 = arith.constant 0 : i32
    return %arg1, %c0_i32 : i32, i32
  }
  func.func @transform_2(%arg0: i32, %arg1: i32, %arg2: i32) -> (i32, i32) {
    %c0_i32 = arith.constant 0 : i32
    %c0_i32_0 = arith.constant 0 : i32
    return %arg1, %c0_i32 : i32, i32
  }
  func.func @transform_3(%arg0: i32, %arg1: i32, %arg2: i32) -> (i32, i32, i32) {
    %c0_i32 = arith.constant 0 : i32
    return %arg0, %arg1, %arg2 : i32, i32, i32
  }
}

</mosaic_0001>

<bundles_post_ra>
// kernel: tpu_custom_call.1
= control target key start
LH: loop header
LB: loop body
LE: loop exit
PB: predicated region body
PF: predicated region fallthrough
CT: control target
= control target key end

     0   :  { %s610_s12 = smov 0   ;;  %s612_s13 = smov 0   ;;  %s657_s0 = inlined_call_operand.vmem [shape: f32[2,32,8], index: 0, kind: input, shape index: {}]   ;;  %s658_s1 = inlined_call_operand.vmem [shape: f32[16,32], index: 1, kind: input, shape index: {}]   ;;  %s659_s2 = inlined_call_operand.vmem [shape: f32[16,1], index: 2, kind: input, shape index: {}]   ;;  %s660_s3 = inlined_call_operand.vmem [shape: f32[2,16,8], index: 3, kind: output, shape index: {}]  }
   0x1   :  { %s614_s14 = smov 0  }
   0x2 LB: > { %s32_s15 = sadd.s32 1, %s583_s13  ;;  %p503_p0 = scmp.ge.s32.totalorder %s587_s14, 1  ;;  %s587_s14 = sphi %s614_s14, %s13_s14   ;;  %s583_s13 = sphi %s612_s13, %s662_s13   ;;  %s579_s12 = sphi %s610_s12, %s661_s12  }
   0x3   : > { %p34_p1 = scmp.ge.s32.totalorder %s32_s15, 2  ;;  %p187_p2 = scmp.lt.s32.totalorder %s587_s14, 3 }
   0x5   : > { %s664_s15 = smov (%p34_p1, %s32_s15), 0  ;;  %p188_p3 = pnand %p503_p0, %p187_p2 }
   0x6   : > { %p231_p4 = scmp.lt.s32.totalorder (!%p188_p3), %s579_s12, 1  ;;  %v264_v0 = vld [vmem:[%s658_s1] sm:$0xff] (!%p188_p3)  ;;  %vm282_vm0 = vcmask (!%p188_p3), 261120   ;;  %v589_v2 = vmov (!%p188_p3), 0   ;;  %v271_v3 = vld [vmem:[%s659_s2 + $0x8] sm:$0xff] (!%p188_p3)  ;;  %vm364_vm1 = vcmask (!%p188_p3), 64512  }
   0x7   : > { %191 = sbr.rel (%p188_p3) target bundleno = 244 (0xf4), region = 32  ;;  %v270_v1 = vld [vmem:[%s659_s2] sm:$0xff] (!%p188_p3)  ;;  %528 = vmatprep.mubr.msk.f32.mxu0 (!%p188_p3), %vm282_vm0, %v264_v0  ;;  %564 = vset.pattern.permute.xlu0 (!%p188_p3), %v589_v2  ;;  %v265_v10 = vld [vmem:[%s658_s1 + $0x8] sm:$0xff] (!%p188_p3) }
   0x8   : > { %274 = vperm.xlu0 (!%p188_p3), %564, %v270_v1  }
   0xc   : > { %279 = vperm.xlu0 (!%p188_p3), %564, %v271_v3  }
   0xe   : > { %s666_s12 = smov (!%p231_p4, %s579_s12), 1 }
   0xf   : > { %s512_s22 = sshll.u32 %s666_s12, 5  ;;  %s513_s28 = sshll.u32 %s666_s12, 4 }
  0x10   : > { %s238_s25 = scalar_lea.vmem %s657_s0, %s512_s22  ;;  %s262_s4 = scalar_lea.vmem %s660_s3, %s513_s28 }
  0x11   : > { %v266_v4 = vld [vmem:[%s238_s25] sm:$0xff]  ;;  %v267_v5 = vld [vmem:[%s238_s25 + $0x8] sm:$0xff]  ;;  %v268_v6 = vld [vmem:[%s238_s25 + $0x10] sm:$0xff] }
  0x12   : > { %v531_v7 = vpack.c.bf16 %v267_v5, %v266_v4  ;;  %v269_v8 = vld [vmem:[%s238_s25 + $0x18] sm:$0xff] }
  0x13   : > { %v535_v9 = vpack.c.bf16 %v269_v8, %v268_v6 }
  0x14   : > { %532 = vmatprep.subr.bf16.mxu0 %v531_v7 }
  0x15   : > { %534 = vmatpush3.bf16.msra.mxu0 %v531_v7 }
  0x16   : > { %536 = vmatprep.subr.bf16.mxu0 %v535_v9 }
  0x19   : > { %538 = vmatpush3.bf16.msra.mxu0 %v535_v9 }
  0x1c   : > { %529 = vmatmul.mubr.msk.f32.vlgmr.msra.gmra.mrb[0].mxu0 %vm282_vm0, %v265_v10 }
  0x87   : > { %v275_v11 = vpop.permute.xlu0 %274 }
  0x8b   : > { %v280_v12 = vpop.permute.xlu0 %279 }
  0xef   : > { %v530_v13 = vpop.f32.mrb[0].mxu0 }
  0xf0   : > { %v361_v14 = vadd.f32 %v530_v13, %v280_v12  ;;  %v355_v15 = vpop.f32.mrb[1].mxu0 }
  0xf1   : > { %v356_v16 = vadd.f32 %v355_v15, %v275_v11 }
  0xf2   : > { %366 = vst.msk [vmem:[%s262_s4 + $0x8] sm:$0xff] %vm364_vm1, %v361_v14 }
  0xf3   : > { %365 = vst.msk [vmem:[%s262_s4] sm:$0xff] %vm364_vm1, %v356_v16 }
  0xf4 PF: > { %s13_s14 = sadd.s32 1, %s587_s14   ;;  %s661_s12 = smov %s583_s13 }
  0xf5   : > { %p10_p5 = scmp.ge.s32.totalorder %s13_s14, 4   ;;  %s662_s13 = smov %s664_s15 }
  0xf7   :  { %12 = sbr.rel (!%p10_p5) target bundleno = 2 (0x2), region = 68 }

</bundles_post_ra>
